<compile_context>
chip_gen: v5e
topology: v5e:2x2
jax: 0.10.0
libtpu: 0.0.40
codegen_flags: <defaults>
</compile_context>

<pallas_src>
import jax
import jax.numpy as jnp
from jax import lax
from jax.experimental import pallas as pl
from jax.experimental.pallas import tpu as pltpu

BN_EPS = 1e-5
_TAPS = tuple((dh, dw) for dh in (-1, 0, 1) for dw in (-1, 0, 1))


def _prep_weight(w, C, CP):
    """PyTorch OIHW (C,C,3,3) -> (CP, 9*CP) with Wmat[co, t*CP + ci] = w[co,ci,kh,kw]."""
    wt = jnp.transpose(w.astype(jnp.float32), (2, 3, 0, 1)).reshape(9, C, C)  # (tap, co, ci)
    wt = jnp.pad(wt, ((0, 0), (0, CP - C), (0, CP - C)))                       # (9, CP, CP)
    return jnp.transpose(wt, (1, 0, 2)).reshape(CP, 9 * CP)                    # (CP, 9*CP)


def residual_conv_block(x_nchw, w1, w2, g1, b1, g2, b2, alpha):
    """x_nchw: (B,C,H,W); w1/w2: (C,C,3,3) OIHW; g*/b*: (C,); alpha: scalar."""
    B, C, H, W = x_nchw.shape
    CP = ((C + 7) // 8) * 8          # channels padded to full sublanes
    N = B * H * W                    # flattened (batch, h, w) -> lane axis

    # ---------------- kernel (closes over static CP, N, W) ----------------
    def kernel(x_ref, m_ref, w1_ref, w2_ref, g1_ref, b1_ref, g2_ref, b2_ref,
               a_ref, o_ref, s_ref):
        # x_ref:  (CP, N) f32 VMEM         m_ref: (9, N) f32 tap-validity masks
        # w*_ref: (CP, 9*CP) f32           g*/b*_ref: (CP, 1) f32
        # a_ref:  (1, 1) f32 SMEM          o_ref: (CP, N) f32
        # s_ref:  (9*CP, N) f32 VMEM scratch (im2col slab, reused by both convs)
        x = x_ref[...]
        inv_n = jnp.float32(1.0 / N)

        def conv3x3(inp, w_ref):
            # im2col via lane rolls (XLU) + masks, then one MXU matmul, K = 9*CP.
            for t, (dh, dw) in enumerate(_TAPS):
                shift = (-(dh * W + dw)) % N
                shifted = pltpu.roll(inp, shift=shift, axis=1) if shift else inp
                s_ref[t * CP:(t + 1) * CP, :] = shifted * m_ref[t:t + 1, :]
            return jnp.dot(w_ref[...], s_ref[...],
                           preferred_element_type=jnp.float32)

        def batchnorm(y, g_ref, b_ref):
            # training-mode BN: batch statistics over (N,H,W) == lane axis,
            # biased variance.
            mean = jnp.sum(y, axis=1, keepdims=True) * inv_n
            var = jnp.sum((y - mean) ** 2, axis=1, keepdims=True) * inv_n
            return (y - mean) * lax.rsqrt(var + BN_EPS) * g_ref[...] + b_ref[...]

        y = batchnorm(conv3x3(x, w1_ref), g1_ref, b1_ref)
        alpha_s = a_ref[0, 0]
        y = jnp.where(y >= 0.0, y, alpha_s * y)            # PReLU
        z = batchnorm(conv3x3(y, w2_ref), g2_ref, b2_ref)
        o_ref[...] = z + x                                 # residual add

    # ---------------- wrapper-side layout plumbing (tiny XLA ops) ----------------
    x_k = jnp.transpose(x_nchw.astype(jnp.float32), (1, 0, 2, 3)).reshape(C, N)
    x_k = jnp.pad(x_k, ((0, CP - C), (0, 0)))              # (CP, N)

    # Precomputed tap-validity masks: mask[t, q] = 1 iff neighbor (h+dh, w+dw)
    # is inside the image for flat position q = b*H*W + h*W + w.
    q = jnp.arange(N, dtype=jnp.int32)
    hh = (q // W) % H
    ww = q % W
    masks = jnp.stack(
        [((hh + dh >= 0) & (hh + dh < H) & (ww + dw >= 0) & (ww + dw < W))
         for dh, dw in _TAPS], axis=0).astype(jnp.float32)  # (9, N)

    w1_k = _prep_weight(w1, C, CP)
    w2_k = _prep_weight(w2, C, CP)

    def prep_vec(v):
        return jnp.pad(jnp.asarray(v, jnp.float32).reshape(C, 1),
                       ((0, CP - C), (0, 0)))

    vmem = pl.BlockSpec(memory_space=pltpu.MemorySpace.VMEM)
    smem = pl.BlockSpec(memory_space=pltpu.MemorySpace.SMEM)

    out_k = pl.pallas_call(
        kernel,
        out_shape=jax.ShapeDtypeStruct((CP, N), jnp.float32),
        in_specs=[vmem] * 8 + [smem],
        out_specs=vmem,
        scratch_shapes=[pltpu.VMEM((9 * CP, N), jnp.float32)],
    )(x_k, masks, w1_k, w2_k, prep_vec(g1), prep_vec(b1),
      prep_vec(g2), prep_vec(b2),
      jnp.asarray(alpha, jnp.float32).reshape(1, 1))

    return jnp.transpose(out_k[:C].reshape(C, B, H, W), (1, 0, 2, 3))


def _reference(x, w1, w2, g1, b1, g2, b2, alpha):
    """Pure-JAX NCHW reference mirroring the PyTorch forward (training-mode BN)."""
    def conv(x, w):
        return lax.conv_general_dilated(
            x, w, window_strides=(1, 1), padding=((1, 1), (1, 1)),
            dimension_numbers=('NCHW', 'OIHW', 'NCHW'))

    def bn(y, g, b):
        mean = jnp.mean(y, axis=(0, 2, 3), keepdims=True)
        var = jnp.mean((y - mean) ** 2, axis=(0, 2, 3), keepdims=True)
        return ((y - mean) * lax.rsqrt(var + BN_EPS) * g.reshape(1, -1, 1, 1)
                + b.reshape(1, -1, 1, 1))

    y = bn(conv(x, w1), g1, b1)
    y = jnp.where(y >= 0.0, y, alpha * y)
    z = bn(conv(y, w2), g2, b2)
    return z + x


if __name__ == "__main__":
    B, C, H, W = 2, 4, 16, 16

    key = jax.random.PRNGKey(0)
    kx, kw1, kw2 = jax.random.split(key, 3)

    x = jax.random.normal(kx, (B, C, H, W), dtype=jnp.float32)

    # Deterministic synthetic parameters (shapes per nn.Conv2d/BatchNorm2d/PReLU defaults)
    w1 = jax.random.normal(kw1, (C, C, 3, 3), dtype=jnp.float32) * 0.1
    w2 = jax.random.normal(kw2, (C, C, 3, 3), dtype=jnp.float32) * 0.1
    g1 = jnp.ones((C,), jnp.float32)
    b1 = jnp.zeros((C,), jnp.float32)
    g2 = jnp.ones((C,), jnp.float32)
    b2 = jnp.zeros((C,), jnp.float32)
    alpha = jnp.float32(0.25)  # PReLU default init

    out = residual_conv_block(x, w1, w2, g1, b1, g2, b2, alpha)
    out = jax.block_until_ready(out)

    ref = _reference(x, w1, w2, g1, b1, g2, b2, alpha)
    assert out.shape == (B, C, H, W)
    err = jnp.max(jnp.abs(out - ref))
    assert jnp.allclose(out, ref, atol=2e-3, rtol=2e-3), f"max err {err}"

    print("KERNEL_OK")
</pallas_src>

<mosaic_0001>
module attributes {stable_mosaic.version = 11 : i64} {
  func.func @kernel(%arg0: memref<8x512xf32, #tpu.memory_space<vmem>>, %arg1: memref<9x512xf32, #tpu.memory_space<vmem>>, %arg2: memref<8x72xf32, #tpu.memory_space<vmem>>, %arg3: memref<8x72xf32, #tpu.memory_space<vmem>>, %arg4: memref<8x1xf32, #tpu.memory_space<vmem>>, %arg5: memref<8x1xf32, #tpu.memory_space<vmem>>, %arg6: memref<8x1xf32, #tpu.memory_space<vmem>>, %arg7: memref<8x1xf32, #tpu.memory_space<vmem>>, %arg8: memref<1x1xf32, #tpu.memory_space<smem>>, %arg9: memref<8x512xf32, #tpu.memory_space<vmem>>, %arg10: memref<72x512xf32, #tpu.memory_space<vmem>>) attributes {dimension_semantics = [], scalar_prefetch = 0 : i64, scratch_operands = 1 : i64, tpu.core_type = #tpu.core_type<tc>} {
    %c0 = arith.constant 0 : index
    %c0_0 = arith.constant 0 : index
    %0 = vector.load %arg0[%c0, %c0_0] : memref<8x512xf32, #tpu.memory_space<vmem>>, vector<8x512xf32>
    %c17_i32 = arith.constant 17 : i32
    %1 = tpu.dynamic_rotate %0 by %c17_i32 dim 1 : vector<8x512xf32>, i32 -> vector<8x512xf32>
    %c0_1 = arith.constant 0 : index
    %c0_2 = arith.constant 0 : index
    %2 = vector.load %arg1[%c0_1, %c0_2] : memref<9x512xf32, #tpu.memory_space<vmem>>, vector<1x512xf32>
    %3 = vector.broadcast %2 : vector<1x512xf32> to vector<8x512xf32>
    %4 = arith.mulf %1, %3 : vector<8x512xf32>
    %c0_3 = arith.constant 0 : index
    %c0_4 = arith.constant 0 : index
    %5 = vector.load %arg10[%c0_3, %c0_4] : memref<72x512xf32, #tpu.memory_space<vmem>>, vector<8x512xf32>
    tpu.vector_store %arg10[%c0_3, %c0_4], %4 {strides = array<i32>} : memref<72x512xf32, #tpu.memory_space<vmem>>, vector<8x512xf32>,
    %c16_i32 = arith.constant 16 : i32
    %6 = tpu.dynamic_rotate %0 by %c16_i32 dim 1 : vector<8x512xf32>, i32 -> vector<8x512xf32>
    %c1 = arith.constant 1 : index
    %c0_5 = arith.constant 0 : index
    %7 = vector.load %arg1[%c1, %c0_5] : memref<9x512xf32, #tpu.memory_space<vmem>>, vector<1x512xf32>
    %8 = vector.broadcast %7 : vector<1x512xf32> to vector<8x512xf32>
    %9 = arith.mulf %6, %8 : vector<8x512xf32>
    %c8 = arith.constant 8 : index
    %c0_6 = arith.constant 0 : index
    %10 = vector.load %arg10[%c8, %c0_6] : memref<72x512xf32, #tpu.memory_space<vmem>>, vector<8x512xf32>
    tpu.vector_store %arg10[%c8, %c0_6], %9 {strides = array<i32>} : memref<72x512xf32, #tpu.memory_space<vmem>>, vector<8x512xf32>,
    %c15_i32 = arith.constant 15 : i32
    %11 = tpu.dynamic_rotate %0 by %c15_i32 dim 1 : vector<8x512xf32>, i32 -> vector<8x512xf32>
    %c2 = arith.constant 2 : index
    %c0_7 = arith.constant 0 : index
    %12 = vector.load %arg1[%c2, %c0_7] : memref<9x512xf32, #tpu.memory_space<vmem>>, vector<1x512xf32>
    %13 = vector.broadcast %12 : vector<1x512xf32> to vector<8x512xf32>
    %14 = arith.mulf %11, %13 : vector<8x512xf32>
    %c16 = arith.constant 16 : index
    %c0_8 = arith.constant 0 : index
    %15 = vector.load %arg10[%c16, %c0_8] : memref<72x512xf32, #tpu.memory_space<vmem>>, vector<8x512xf32>
    tpu.vector_store %arg10[%c16, %c0_8], %14 {strides = array<i32>} : memref<72x512xf32, #tpu.memory_space<vmem>>, vector<8x512xf32>,
    %c1_i32 = arith.constant 1 : i32
    %16 = tpu.dynamic_rotate %0 by %c1_i32 dim 1 : vector<8x512xf32>, i32 -> vector<8x512xf32>
    %c3 = arith.constant 3 : index
    %c0_9 = arith.constant 0 : index
    %17 = vector.load %arg1[%c3, %c0_9] : memref<9x512xf32, #tpu.memory_space<vmem>>, vector<1x512xf32>
    %18 = vector.broadcast %17 : vector<1x512xf32> to vector<8x512xf32>
    %19 = arith.mulf %16, %18 : vector<8x512xf32>
    %c24 = arith.constant 24 : index
    %c0_10 = arith.constant 0 : index
    %20 = vector.load %arg10[%c24, %c0_10] : memref<72x512xf32, #tpu.memory_space<vmem>>, vector<8x512xf32>
    tpu.vector_store %arg10[%c24, %c0_10], %19 {strides = array<i32>} : memref<72x512xf32, #tpu.memory_space<vmem>>, vector<8x512xf32>,
    %c4 = arith.constant 4 : index
    %c0_11 = arith.constant 0 : index
    %21 = vector.load %arg1[%c4, %c0_11] : memref<9x512xf32, #tpu.memory_space<vmem>>, vector<1x512xf32>
    %22 = vector.broadcast %21 : vector<1x512xf32> to vector<8x512xf32>
    %23 = arith.mulf %0, %22 : vector<8x512xf32>
    %c32 = arith.constant 32 : index
    %c0_12 = arith.constant 0 : index
    %24 = vector.load %arg10[%c32, %c0_12] : memref<72x512xf32, #tpu.memory_space<vmem>>, vector<8x512xf32>
    tpu.vector_store %arg10[%c32, %c0_12], %23 {strides = array<i32>} : memref<72x512xf32, #tpu.memory_space<vmem>>, vector<8x512xf32>,
    %c511_i32 = arith.constant 511 : i32
    %25 = tpu.dynamic_rotate %0 by %c511_i32 dim 1 : vector<8x512xf32>, i32 -> vector<8x512xf32>
    %c5 = arith.constant 5 : index
    %c0_13 = arith.constant 0 : index
    %26 = vector.load %arg1[%c5, %c0_13] : memref<9x512xf32, #tpu.memory_space<vmem>>, vector<1x512xf32>
    %27 = vector.broadcast %26 : vector<1x512xf32> to vector<8x512xf32>
    %28 = arith.mulf %25, %27 : vector<8x512xf32>
    %c40 = arith.constant 40 : index
    %c0_14 = arith.constant 0 : index
    %29 = vector.load %arg10[%c40, %c0_14] : memref<72x512xf32, #tpu.memory_space<vmem>>, vector<8x512xf32>
    tpu.vector_store %arg10[%c40, %c0_14], %28 {strides = array<i32>} : memref<72x512xf32, #tpu.memory_space<vmem>>, vector<8x512xf32>,
    %c497_i32 = arith.constant 497 : i32
    %30 = tpu.dynamic_rotate %0 by %c497_i32 dim 1 : vector<8x512xf32>, i32 -> vector<8x512xf32>
    %c6 = arith.constant 6 : index
    %c0_15 = arith.constant 0 : index
    %31 = vector.load %arg1[%c6, %c0_15] : memref<9x512xf32, #tpu.memory_space<vmem>>, vector<1x512xf32>
    %32 = vector.broadcast %31 : vector<1x512xf32> to vector<8x512xf32>
    %33 = arith.mulf %30, %32 : vector<8x512xf32>
    %c48 = arith.constant 48 : index
    %c0_16 = arith.constant 0 : index
    %34 = vector.load %arg10[%c48, %c0_16] : memref<72x512xf32, #tpu.memory_space<vmem>>, vector<8x512xf32>
    tpu.vector_store %arg10[%c48, %c0_16], %33 {strides = array<i32>} : memref<72x512xf32, #tpu.memory_space<vmem>>, vector<8x512xf32>,
    %c496_i32 = arith.constant 496 : i32
    %35 = tpu.dynamic_rotate %0 by %c496_i32 dim 1 : vector<8x512xf32>, i32 -> vector<8x512xf32>
    %c7 = arith.constant 7 : index
    %c0_17 = arith.constant 0 : index
    %36 = vector.load %arg1[%c7, %c0_17] : memref<9x512xf32, #tpu.memory_space<vmem>>, vector<1x512xf32>
    %37 = vector.broadcast %36 : vector<1x512xf32> to vector<8x512xf32>
    %38 = arith.mulf %35, %37 : vector<8x512xf32>
    %c56 = arith.constant 56 : index
    %c0_18 = arith.constant 0 : index
    %39 = vector.load %arg10[%c56, %c0_18] : memref<72x512xf32, #tpu.memory_space<vmem>>, vector<8x512xf32>
    tpu.vector_store %arg10[%c56, %c0_18], %38 {strides = array<i32>} : memref<72x512xf32, #tpu.memory_space<vmem>>, vector<8x512xf32>,
    %c495_i32 = arith.constant 495 : i32
    %40 = tpu.dynamic_rotate %0 by %c495_i32 dim 1 : vector<8x512xf32>, i32 -> vector<8x512xf32>
    %c8_19 = arith.constant 8 : index
    %c0_20 = arith.constant 0 : index
    %41 = vector.load %arg1[%c8_19, %c0_20] : memref<9x512xf32, #tpu.memory_space<vmem>>, vector<1x512xf32>
    %42 = vector.broadcast %41 : vector<1x512xf32> to vector<8x512xf32>
    %43 = arith.mulf %40, %42 : vector<8x512xf32>
    %c64 = arith.constant 64 : index
    %c0_21 = arith.constant 0 : index
    %44 = vector.load %arg10[%c64, %c0_21] : memref<72x512xf32, #tpu.memory_space<vmem>>, vector<8x512xf32>
    tpu.vector_store %arg10[%c64, %c0_21], %43 {strides = array<i32>} : memref<72x512xf32, #tpu.memory_space<vmem>>, vector<8x512xf32>,
    %c0_22 = arith.constant 0 : index
    %c0_23 = arith.constant 0 : index
    %45 = vector.load %arg2[%c0_22, %c0_23] : memref<8x72xf32, #tpu.memory_space<vmem>>, vector<8x72xf32>
    %c0_24 = arith.constant 0 : index
    %c0_25 = arith.constant 0 : index
    %46 = vector.load %arg10[%c0_24, %c0_25] : memref<72x512xf32, #tpu.memory_space<vmem>>, vector<72x512xf32>
    %cst = arith.constant dense<0.000000e+00> : vector<8x512xf32>
    %47 = tpu.matmul %45, %46, %cst {dimension_numbers = #tpu.dot_dimension_numbers<[1], [0], [0], [1], [0, 0, 1, 1], [], []>} : vector<8x72xf32>, vector<72x512xf32>, vector<8x512xf32> -> vector<8x512xf32>
    %cst_26 = arith.constant dense<0.000000e+00> : vector<8xf32>
    %48 = vector.multi_reduction <add>, %47, %cst_26 [1] : vector<8x512xf32> to vector<8xf32>
    %49 = vector.shape_cast %48 : vector<8xf32> to vector<8x1xf32>
    %cst_27 = arith.constant 0.001953125 : f32
    %50 = vector.broadcast %cst_27 : f32 to vector<8x1xf32>
    %51 = arith.mulf %49, %50 : vector<8x1xf32>
    %52 = vector.broadcast %51 : vector<8x1xf32> to vector<8x512xf32>
    %53 = arith.subf %47, %52 : vector<8x512xf32>
    %54 = arith.mulf %53, %53 : vector<8x512xf32>
    %cst_28 = arith.constant dense<0.000000e+00> : vector<8xf32>
    %55 = vector.multi_reduction <add>, %54, %cst_28 [1] : vector<8x512xf32> to vector<8xf32>
    %56 = vector.shape_cast %55 : vector<8xf32> to vector<8x1xf32>
    %cst_29 = arith.constant 0.001953125 : f32
    %57 = vector.broadcast %cst_29 : f32 to vector<8x1xf32>
    %58 = arith.mulf %56, %57 : vector<8x1xf32>
    %59 = vector.broadcast %51 : vector<8x1xf32> to vector<8x512xf32>
    %60 = arith.subf %47, %59 : vector<8x512xf32>
    %cst_30 = arith.constant 9.99999974E-6 : f32
    %61 = vector.broadcast %cst_30 : f32 to vector<8x1xf32>
    %62 = arith.addf %58, %61 : vector<8x1xf32>
    %63 = math.rsqrt %62 : vector<8x1xf32>
    %64 = vector.broadcast %63 : vector<8x1xf32> to vector<8x512xf32>
    %65 = arith.mulf %60, %64 : vector<8x512xf32>
    %c0_31 = arith.constant 0 : index
    %c0_32 = arith.constant 0 : index
    %66 = vector.load %arg4[%c0_31, %c0_32] : memref<8x1xf32, #tpu.memory_space<vmem>>, vector<8x1xf32>
    %67 = vector.broadcast %66 : vector<8x1xf32> to vector<8x512xf32>
    %68 = arith.mulf %65, %67 : vector<8x512xf32>
    %c0_33 = arith.constant 0 : index
    %c0_34 = arith.constant 0 : index
    %69 = vector.load %arg5[%c0_33, %c0_34] : memref<8x1xf32, #tpu.memory_space<vmem>>, vector<8x1xf32>
    %70 = vector.broadcast %69 : vector<8x1xf32> to vector<8x512xf32>
    %71 = arith.addf %68, %70 : vector<8x512xf32>
    %c0_35 = arith.constant 0 : index
    %c0_36 = arith.constant 0 : index
    %72 = memref.load %arg8[%c0_35, %c0_36] : memref<1x1xf32, #tpu.memory_space<smem>>
    %cst_37 = arith.constant 0.000000e+00 : f32
    %73 = vector.broadcast %cst_37 : f32 to vector<8x512xf32>
    %74 = arith.cmpf oge, %71, %73 : vector<8x512xf32>
    %75 = vector.broadcast %72 : f32 to vector<8x512xf32>
    %76 = arith.mulf %75, %71 : vector<8x512xf32>
    %77 = arith.select %74, %71, %76 : vector<8x512xi1>, vector<8x512xf32>
    %c17_i32_38 = arith.constant 17 : i32
    %78 = tpu.dynamic_rotate %77 by %c17_i32_38 dim 1 : vector<8x512xf32>, i32 -> vector<8x512xf32>
    %c0_39 = arith.constant 0 : index
    %c0_40 = arith.constant 0 : index
    %79 = vector.load %arg1[%c0_39, %c0_40] : memref<9x512xf32, #tpu.memory_space<vmem>>, vector<1x512xf32>
    %80 = vector.broadcast %79 : vector<1x512xf32> to vector<8x512xf32>
    %81 = arith.mulf %78, %80 : vector<8x512xf32>
    %c0_41 = arith.constant 0 : index
    %c0_42 = arith.constant 0 : index
    %82 = vector.load %arg10[%c0_41, %c0_42] : memref<72x512xf32, #tpu.memory_space<vmem>>, vector<8x512xf32>
    tpu.vector_store %arg10[%c0_41, %c0_42], %81 {strides = array<i32>} : memref<72x512xf32, #tpu.memory_space<vmem>>, vector<8x512xf32>,
    %c16_i32_43 = arith.constant 16 : i32
    %83 = tpu.dynamic_rotate %77 by %c16_i32_43 dim 1 : vector<8x512xf32>, i32 -> vector<8x512xf32>
    %c1_44 = arith.constant 1 : index
    %c0_45 = arith.constant 0 : index
    %84 = vector.load %arg1[%c1_44, %c0_45] : memref<9x512xf32, #tpu.memory_space<vmem>>, vector<1x512xf32>
    %85 = vector.broadcast %84 : vector<1x512xf32> to vector<8x512xf32>
    %86 = arith.mulf %83, %85 : vector<8x512xf32>
    %c8_46 = arith.constant 8 : index
    %c0_47 = arith.constant 0 : index
    %87 = vector.load %arg10[%c8_46, %c0_47] : memref<72x512xf32, #tpu.memory_space<vmem>>, vector<8x512xf32>
    tpu.vector_store %arg10[%c8_46, %c0_47], %86 {strides = array<i32>} : memref<72x512xf32, #tpu.memory_space<vmem>>, vector<8x512xf32>,
    %c15_i32_48 = arith.constant 15 : i32
    %88 = tpu.dynamic_rotate %77 by %c15_i32_48 dim 1 : vector<8x512xf32>, i32 -> vector<8x512xf32>
    %c2_49 = arith.constant 2 : index
    %c0_50 = arith.constant 0 : index
    %89 = vector.load %arg1[%c2_49, %c0_50] : memref<9x512xf32, #tpu.memory_space<vmem>>, vector<1x512xf32>
    %90 = vector.broadcast %89 : vector<1x512xf32> to vector<8x512xf32>
    %91 = arith.mulf %88, %90 : vector<8x512xf32>
    %c16_51 = arith.constant 16 : index
    %c0_52 = arith.constant 0 : index
    %92 = vector.load %arg10[%c16_51, %c0_52] : memref<72x512xf32, #tpu.memory_space<vmem>>, vector<8x512xf32>
    tpu.vector_store %arg10[%c16_51, %c0_52], %91 {strides = array<i32>} : memref<72x512xf32, #tpu.memory_space<vmem>>, vector<8x512xf32>,
    %c1_i32_53 = arith.constant 1 : i32
    %93 = tpu.dynamic_rotate %77 by %c1_i32_53 dim 1 : vector<8x512xf32>, i32 -> vector<8x512xf32>
    %c3_54 = arith.constant 3 : index
    %c0_55 = arith.constant 0 : index
    %94 = vector.load %arg1[%c3_54, %c0_55] : memref<9x512xf32, #tpu.memory_space<vmem>>, vector<1x512xf32>
    %95 = vector.broadcast %94 : vector<1x512xf32> to vector<8x512xf32>
    %96 = arith.mulf %93, %95 : vector<8x512xf32>
    %c24_56 = arith.constant 24 : index
    %c0_57 = arith.constant 0 : index
    %97 = vector.load %arg10[%c24_56, %c0_57] : memref<72x512xf32, #tpu.memory_space<vmem>>, vector<8x512xf32>
    tpu.vector_store %arg10[%c24_56, %c0_57], %96 {strides = array<i32>} : memref<72x512xf32, #tpu.memory_space<vmem>>, vector<8x512xf32>,
    %c4_58 = arith.constant 4 : index
    %c0_59 = arith.constant 0 : index
    %98 = vector.load %arg1[%c4_58, %c0_59] : memref<9x512xf32, #tpu.memory_space<vmem>>, vector<1x512xf32>
    %99 = vector.broadcast %98 : vector<1x512xf32> to vector<8x512xf32>
    %100 = arith.mulf %77, %99 : vector<8x512xf32>
    %c32_60 = arith.constant 32 : index
    %c0_61 = arith.constant 0 : index
    %101 = vector.load %arg10[%c32_60, %c0_61] : memref<72x512xf32, #tpu.memory_space<vmem>>, vector<8x512xf32>
    tpu.vector_store %arg10[%c32_60, %c0_61], %100 {strides = array<i32>} : memref<72x512xf32, #tpu.memory_space<vmem>>, vector<8x512xf32>,
    %c511_i32_62 = arith.constant 511 : i32
    %102 = tpu.dynamic_rotate %77 by %c511_i32_62 dim 1 : vector<8x512xf32>, i32 -> vector<8x512xf32>
    %c5_63 = arith.constant 5 : index
    %c0_64 = arith.constant 0 : index
    %103 = vector.load %arg1[%c5_63, %c0_64] : memref<9x512xf32, #tpu.memory_space<vmem>>, vector<1x512xf32>
    %104 = vector.broadcast %103 : vector<1x512xf32> to vector<8x512xf32>
    %105 = arith.mulf %102, %104 : vector<8x512xf32>
    %c40_65 = arith.constant 40 : index
    %c0_66 = arith.constant 0 : index
    %106 = vector.load %arg10[%c40_65, %c0_66] : memref<72x512xf32, #tpu.memory_space<vmem>>, vector<8x512xf32>
    tpu.vector_store %arg10[%c40_65, %c0_66], %105 {strides = array<i32>} : memref<72x512xf32, #tpu.memory_space<vmem>>, vector<8x512xf32>,
    %c497_i32_67 = arith.constant 497 : i32
    %107 = tpu.dynamic_rotate %77 by %c497_i32_67 dim 1 : vector<8x512xf32>, i32 -> vector<8x512xf32>
    %c6_68 = arith.constant 6 : index
    %c0_69 = arith.constant 0 : index
    %108 = vector.load %arg1[%c6_68, %c0_69] : memref<9x512xf32, #tpu.memory_space<vmem>>, vector<1x512xf32>
    %109 = vector.broadcast %108 : vector<1x512xf32> to vector<8x512xf32>
    %110 = arith.mulf %107, %109 : vector<8x512xf32>
    %c48_70 = arith.constant 48 : index
    %c0_71 = arith.constant 0 : index
    %111 = vector.load %arg10[%c48_70, %c0_71] : memref<72x512xf32, #tpu.memory_space<vmem>>, vector<8x512xf32>
    tpu.vector_store %arg10[%c48_70, %c0_71], %110 {strides = array<i32>} : memref<72x512xf32, #tpu.memory_space<vmem>>, vector<8x512xf32>,
    %c496_i32_72 = arith.constant 496 : i32
    %112 = tpu.dynamic_rotate %77 by %c496_i32_72 dim 1 : vector<8x512xf32>, i32 -> vector<8x512xf32>
    %c7_73 = arith.constant 7 : index
    %c0_74 = arith.constant 0 : index
    %113 = vector.load %arg1[%c7_73, %c0_74] : memref<9x512xf32, #tpu.memory_space<vmem>>, vector<1x512xf32>
    %114 = vector.broadcast %113 : vector<1x512xf32> to vector<8x512xf32>
    %115 = arith.mulf %112, %114 : vector<8x512xf32>
    %c56_75 = arith.constant 56 : index
    %c0_76 = arith.constant 0 : index
    %116 = vector.load %arg10[%c56_75, %c0_76] : memref<72x512xf32, #tpu.memory_space<vmem>>, vector<8x512xf32>
    tpu.vector_store %arg10[%c56_75, %c0_76], %115 {strides = array<i32>} : memref<72x512xf32, #tpu.memory_space<vmem>>, vector<8x512xf32>,
    %c495_i32_77 = arith.constant 495 : i32
    %117 = tpu.dynamic_rotate %77 by %c495_i32_77 dim 1 : vector<8x512xf32>, i32 -> vector<8x512xf32>
    %c8_78 = arith.constant 8 : index
    %c0_79 = arith.constant 0 : index
    %118 = vector.load %arg1[%c8_78, %c0_79] : memref<9x512xf32, #tpu.memory_space<vmem>>, vector<1x512xf32>
    %119 = vector.broadcast %118 : vector<1x512xf32> to vector<8x512xf32>
    %120 = arith.mulf %117, %119 : vector<8x512xf32>
    %c64_80 = arith.constant 64 : index
    %c0_81 = arith.constant 0 : index
    %121 = vector.load %arg10[%c64_80, %c0_81] : memref<72x512xf32, #tpu.memory_space<vmem>>, vector<8x512xf32>
    tpu.vector_store %arg10[%c64_80, %c0_81], %120 {strides = array<i32>} : memref<72x512xf32, #tpu.memory_space<vmem>>, vector<8x512xf32>,
    %c0_82 = arith.constant 0 : index
    %c0_83 = arith.constant 0 : index
    %122 = vector.load %arg3[%c0_82, %c0_83] : memref<8x72xf32, #tpu.memory_space<vmem>>, vector<8x72xf32>
    %c0_84 = arith.constant 0 : index
    %c0_85 = arith.constant 0 : index
    %123 = vector.load %arg10[%c0_84, %c0_85] : memref<72x512xf32, #tpu.memory_space<vmem>>, vector<72x512xf32>
    %cst_86 = arith.constant dense<0.000000e+00> : vector<8x512xf32>
    %124 = tpu.matmul %122, %123, %cst_86 {dimension_numbers = #tpu.dot_dimension_numbers<[1], [0], [0], [1], [0, 0, 1, 1], [], []>} : vector<8x72xf32>, vector<72x512xf32>, vector<8x512xf32> -> vector<8x512xf32>
    %cst_87 = arith.constant dense<0.000000e+00> : vector<8xf32>
    %125 = vector.multi_reduction <add>, %124, %cst_87 [1] : vector<8x512xf32> to vector<8xf32>
    %126 = vector.shape_cast %125 : vector<8xf32> to vector<8x1xf32>
    %cst_88 = arith.constant 0.001953125 : f32
    %127 = vector.broadcast %cst_88 : f32 to vector<8x1xf32>
    %128 = arith.mulf %126, %127 : vector<8x1xf32>
    %129 = vector.broadcast %128 : vector<8x1xf32> to vector<8x512xf32>
    %130 = arith.subf %124, %129 : vector<8x512xf32>
    %131 = arith.mulf %130, %130 : vector<8x512xf32>
    %cst_89 = arith.constant dense<0.000000e+00> : vector<8xf32>
    %132 = vector.multi_reduction <add>, %131, %cst_89 [1] : vector<8x512xf32> to vector<8xf32>
    %133 = vector.shape_cast %132 : vector<8xf32> to vector<8x1xf32>
    %cst_90 = arith.constant 0.001953125 : f32
    %134 = vector.broadcast %cst_90 : f32 to vector<8x1xf32>
    %135 = arith.mulf %133, %134 : vector<8x1xf32>
    %136 = vector.broadcast %128 : vector<8x1xf32> to vector<8x512xf32>
    %137 = arith.subf %124, %136 : vector<8x512xf32>
    %cst_91 = arith.constant 9.99999974E-6 : f32
    %138 = vector.broadcast %cst_91 : f32 to vector<8x1xf32>
    %139 = arith.addf %135, %138 : vector<8x1xf32>
    %140 = math.rsqrt %139 : vector<8x1xf32>
    %141 = vector.broadcast %140 : vector<8x1xf32> to vector<8x512xf32>
    %142 = arith.mulf %137, %141 : vector<8x512xf32>
    %c0_92 = arith.constant 0 : index
    %c0_93 = arith.constant 0 : index
    %143 = vector.load %arg6[%c0_92, %c0_93] : memref<8x1xf32, #tpu.memory_space<vmem>>, vector<8x1xf32>
    %144 = vector.broadcast %143 : vector<8x1xf32> to vector<8x512xf32>
    %145 = arith.mulf %142, %144 : vector<8x512xf32>
    %c0_94 = arith.constant 0 : index
    %c0_95 = arith.constant 0 : index
    %146 = vector.load %arg7[%c0_94, %c0_95] : memref<8x1xf32, #tpu.memory_space<vmem>>, vector<8x1xf32>
    %147 = vector.broadcast %146 : vector<8x1xf32> to vector<8x512xf32>
    %148 = arith.addf %145, %147 : vector<8x512xf32>
    %149 = arith.addf %148, %0 : vector<8x512xf32>
    %c0_96 = arith.constant 0 : index
    %c0_97 = arith.constant 0 : index
    %150 = vector.load %arg9[%c0_96, %c0_97] : memref<8x512xf32, #tpu.memory_space<vmem>>, vector<8x512xf32>
    tpu.vector_store %arg9[%c0_96, %c0_97], %149 {strides = array<i32>} : memref<8x512xf32, #tpu.memory_space<vmem>>, vector<8x512xf32>,
    return
  }
}

</mosaic_0001>

<bundles_post_ra>
// kernel: tpu_custom_call.1
= control target key start
LH: loop header
LB: loop body
LE: loop exit
PB: predicated region body
PF: predicated region fallthrough
CT: control target
= control target key end

     0   :  { %15 = vsyncpa [#allocation5], 0  ;;  %s1559_s0 = inlined_call_operand.hbm [shape: f32[8,512], index: 0, kind: input, shape index: {}]   ;;  %s1560_s1 = inlined_call_operand.hbm [shape: f32[9,512], index: 1, kind: input, shape index: {}]   ;;  %s1561_s2 = inlined_call_operand.vmem [shape: f32[8,72], index: 2, kind: input, shape index: {}]   ;;  %s1562_s3 = inlined_call_operand.vmem [shape: f32[8,72], index: 3, kind: input, shape index: {}]   ;;  %s1563_s4 = inlined_call_operand.vmem [shape: f32[8,1], index: 4, kind: input, shape index: {}]   ;;  %s1564_s5 = inlined_call_operand.vmem [shape: f32[8,1], index: 5, kind: input, shape index: {}]   ;;  %s1565_s6 = inlined_call_operand.vmem [shape: f32[8,1], index: 6, kind: input, shape index: {}]   ;;  %s1566_s7 = inlined_call_operand.vmem [shape: f32[8,1], index: 7, kind: input, shape index: {}]   ;;  %s1567_s8 = inlined_call_operand.<no memory space> [shape: f32[1,1], index: 8, kind: input, shape index: {}]   ;;  %s1568_s9 = inlined_call_operand.hbm [shape: f32[8,512], index: 9, kind: output, shape index: {}]  }
   0x1   :  { %16 = vsyncpa [#allocation8], 0 }
   0x2   :  { %17 = vsyncpa [#allocation6], 0  ;;  %s23_s11 = sshll.u32 %s1559_s0, 4  ;;  %s1103_s12 = smov [#allocation4]   ;;  %s24_s11 = int_to_ptr.hbm [resolvable:$true] %s23_s11 }
   0x3   :  { %s25_s13 = sshll.u32 %s1103_s12, 4  ;;  %s33_s16 = sshll.u32 %s1560_s1, 4  ;;  %s26_s13 = int_to_ptr.vmem [resolvable:$true] %s25_s13  ;;  %s34_s16 = int_to_ptr.hbm [resolvable:$true] %s33_s16 }
   0x4   :  { %28 = dma.hbm_to_vmem [thread:$0]  %s24_s11, 512, %s26_s13, [#allocation5]  }
   0x5   :  { %s1104_s17 = smov [#allocation7]   ;;  %s1105_s19 = smov 512  }
   0x6   :  { %s35_s18 = sshll.u32 %s1104_s17, 4  ;;  %s1106_s20 = smov 32   ;;  %s36_s18 = int_to_ptr.vmem [resolvable:$true] %s35_s18 }
   0x7   :  { %41 = dma.hbm_to_vmem [thread:$0]  %s34_s16, 1024, %s36_s18, [#allocation8], %s1105_s19, %s1105_s19, %s1106_s20  }
   0x8   :  { %1097 = dma.done.wait [#allocation5], 512  }
   0x9   :  { %1098 = vsyncadd [#allocation5], 4294966784 }
   0xa   :  { %1099 = dma.done.wait [#allocation8], 1024  }
   0xb   :  { %1100 = vsyncadd [#allocation8], 4294966272  ;;  %v1173_v0 = vld [vmem:[#allocation4 + $0x10] sm:$0xff]  ;;  %v1175_v1 = vld [vmem:[#allocation4] sm:$0xff]  ;;  %s1107_s0 = smov 112   ;;  %s1108_s1 = smov 111   ;;  %v76_v6 = vlaneseq }
   0xc   :  { %284 = vrot.lane.b32.xlu1 %v1173_v0, %s1107_s0  ;;  %316 = vrot.lane.b32.xlu0 %v1173_v0, %s1108_s1  ;;  %v1183_v2 = vld [vmem:[#allocation4 + $0x18] sm:$0xff]  ;;  %s1109_s21 = smov 113   ;;  %v1191_v3 = vld [vmem:[#allocation4 + $0x8] sm:$0xff]  ;;  %s1110_s22 = smov 127   ;;  %vm381_vm8 = vcmask 588800  }
   0xd   :  { %312 = vrot.lane.b32.xlu2 %v1175_v1, %s1108_s1  ;;  %s1111_s23 = smov 1   ;;  %s1112_s24 = smov 15   ;;  %v1247_v7 = vand.u32 127, %v76_v6  ;;  %v326_v8 = vld [vmem:[#allocation7 + $0x20] ss:$8 sm:$0xf] }
   0xe   :  { %s1113_s25 = smov 16   ;;  %s1114_s26 = smov 17   ;;  %v328_v9 = vperm.slane %v326_v8, 0  ;;  %v329_v13 = vperm.slane %v326_v8, 1  ;;  %v330_v19 = vperm.slane %v326_v8, 2  ;;  %v331_v20 = vperm.slane %v326_v8, 3 }
   0xf   :  { %vm320_vm0 = vcmp.lt.s32.totalorder %v1247_v7, 111  ;;  %v1256_v18 = vld [vmem:[#allocation7 + $0x7] ss:$8 sm:$0xf]  ;;  %vm288_vm1 = vcmp.lt.s32.totalorder %v1247_v7, 112  ;;  %vm256_vm2 = vcmp.lt.s32.totalorder %v1247_v7, 113 }
  0x10   :  { %v298_v24 = vperm.slane %v1256_v18, 2  ;;  %v262_v30 = vld [vmem:[#allocation7 + $0x6] ss:$8 sm:$0xf]  ;;  %v299_v33 = vperm.slane %v1256_v18, 3  ;;  %vm224_vm3 = vcmp.lt.s32.totalorder %v1247_v7, 127 }
  0x11   :  { %v266_v32 = vperm.slane %v262_v30, 2  ;;  %v267_v36 = vperm.slane %v262_v30, 3  ;;  %v230_v43 = vld [vmem:[#allocation7 + $0x5] ss:$8 sm:$0xf]  ;;  %v296_v54 = vperm.slane %v1256_v18, 0 }
  0x12   :  { %v198_v44 = vld [vmem:[#allocation7 + $0x4] ss:$8 sm:$0xf]  ;;  %v234_v46 = vperm.slane %v230_v43, 2  ;;  %v297_v55 = vperm.slane %v1256_v18, 1  ;;  %v235_v56 = vperm.slane %v230_v43, 3 }
  0x13   :  { %v202_v47 = vperm.slane %v198_v44, 2  ;;  %v264_v57 = vperm.slane %v262_v30, 0  ;;  %v265_v58 = vperm.slane %v262_v30, 1  ;;  %v233_v59 = vperm.slane %v230_v43, 1  ;;  %s982_s17 = sshll.u32 %s1568_s9, 4  ;;  %s983_s17 = int_to_ptr.hbm [resolvable:$true] %s982_s17 }
  0x14   :  { %286 = vrot.lane.b32.xlu1 %v1183_v2, %s1107_s0  ;;  %318 = vrot.lane.b32.xlu0 %v1183_v2, %s1108_s1  ;;  %v203_v60 = vperm.slane %v198_v44, 3  ;;  %v232_v6 = vperm.slane %v230_v43, 0  ;;  %vm173_vm4 = vcmp.lt.s32.totalorder %v1247_v7, 1  ;;  %vm141_vm5 = vcmp.lt.s32.totalorder %v1247_v7, 15 }
  0x15   :  { %252 = vrot.lane.b32.xlu2 %v1173_v0, %s1109_s21  ;;  %v210_v52 = vmul.f32 %v202_v47, %v1173_v0  ;;  %vm109_vm6 = vcmp.lt.s32.totalorder %v1247_v7, 16  ;;  %vm78_vm7 = vcmp.lt.s32.totalorder %v1247_v7, 17 }
  0x16   :  { %v211_v18 = vmul.f32 %v203_v60, %v1183_v2 }
  0x1c   :  { %254 = vrot.lane.b32.xlu0 %v1183_v2, %s1109_s21  ;;  %280 = vrot.lane.b32.xlu1 %v1175_v1, %s1107_s0 }
  0x1d   :  { %314 = vrot.lane.b32.xlu2 %v1191_v3, %s1108_s1 }
  0x24   :  { %220 = vrot.lane.b32.xlu0 %v1173_v0, %s1110_s22  ;;  %222 = vrot.lane.b32.xlu1 %v1183_v2, %s1110_s22 }
  0x25   :  { %248 = vrot.lane.b32.xlu2 %v1175_v1, %s1109_s21 }
  0x2c   :  { %282 = vrot.lane.b32.xlu0 %v1191_v3, %s1107_s0  ;;  %216 = vrot.lane.b32.xlu1 %v1175_v1, %s1110_s22 }
  0x2d   :  { %250 = vrot.lane.b32.xlu2 %v1191_v3, %s1109_s21 }
  0x34   :  { %167 = vrot.lane.b32.xlu0 %v1191_v3, %s1111_s23  ;;  %169 = vrot.lane.b32.xlu1 %v1173_v0, %s1111_s23 }
  0x35   :  { %218 = vrot.lane.b32.xlu2 %v1191_v3, %s1110_s22 }
  0x3c   :  { %135 = vrot.lane.b32.xlu0 %v1191_v3, %s1112_s24  ;;  %137 = vrot.lane.b32.xlu1 %v1173_v0, %s1112_s24 }
  0x3d   :  { %171 = vrot.lane.b32.xlu2 %v1183_v2, %s1111_s23 }
  0x44   :  { %103 = vrot.lane.b32.xlu0 %v1191_v3, %s1113_s25  ;;  %105 = vrot.lane.b32.xlu1 %v1173_v0, %s1113_s25 }
  0x45   :  { %139 = vrot.lane.b32.xlu2 %v1183_v2, %s1112_s24 }
  0x4c   :  { %165 = vrot.lane.b32.xlu0 %v1175_v1, %s1111_s23  ;;  %70 = vrot.lane.b32.xlu1 %v1191_v3, %s1114_s26 }
  0x4d   :  { %72 = vrot.lane.b32.xlu2 %v1173_v0, %s1114_s26 }
  0x54   :  { %107 = vrot.lane.b32.xlu0 %v1183_v2, %s1113_s25  ;;  %133 = vrot.lane.b32.xlu1 %v1175_v1, %s1112_s24 }
  0x55   :  { %74 = vrot.lane.b32.xlu2 %v1183_v2, %s1114_s26 }
  0x5c   :  { %101 = vrot.lane.b32.xlu0 %v1175_v1, %s1113_s25  ;;  %68 = vrot.lane.b32.xlu1 %v1175_v1, %s1114_s26 }
  0x67   :  { %v313_v4 = vpop.permute.xlu2 %312 }
  0x6f   :  { %v1245_v5 = vpop.permute.xlu2 %252 }
  0x77   :  { %v315_v10 = vpop.permute.xlu2 %314 }
  0x78   :  { %v323_v11 = vsel %vm320_vm0, %v313_v4, %v315_v10 }
  0x79   :  { %v336_v12 = vmul.f32 %v328_v9, %v323_v11 }
  0x7b   :  { %392 = vmatpush.msra.mxu0 %v336_v12 }
  0x7e   :  { %v1252_v14 = vpop.permute.xlu1 %284  ;;  %v317_v15 = vpop.permute.xlu0 %316 }
  0x7f   :  { %v322_v16 = vsel %vm320_vm0, %v315_v10, %v317_v15  ;;  %v249_v21 = vpop.permute.xlu2 %248 }
  0x80   :  { %v337_v17 = vmul.f32 %v329_v13, %v322_v16  ;;  %v201_v16 = vperm.slane %v198_v44, 1 }
  0x82   :  { %412 = vmatpush.msra.mxu1 %v337_v17  ;;  %v209_v2 = vmul.f32 %v201_v16, %v1191_v3 }
  0x86   :  { %v287_v22 = vpop.permute.xlu1 %286  ;;  %v319_v23 = vpop.permute.xlu0 %318 }
  0x87   :  { %v289_v25 = vsel %vm288_vm1, %v1252_v14, %v287_v22  ;;  %v321_v26 = vsel %vm320_vm0, %v317_v15, %v319_v23  ;;  %v324_v27 = vsel %vm320_vm0, %v319_v23, %v313_v4  ;;  %v251_v40 = vpop.permute.xlu2 %250  ;;  %v1296_v15 = vld [vmem:[#allocation7 + $0x3] ss:$8 sm:$0xf] }
  0x88   :  { %v338_v28 = vmul.f32 %v330_v19, %v321_v26  ;;  %v339_v29 = vmul.f32 %v331_v20, %v324_v27  ;;  %v306_v31 = vmul.f32 %v298_v24, %v289_v25  ;;  %v258_v61 = vsel %vm256_vm2, %v251_v40, %v1245_v5 }
  0x89   :  { %v259_v62 = vsel %vm256_vm2, %v249_v21, %v251_v40  ;;  %v273_v19 = vmul.f32 %v265_v58, %v258_v61  ;;  %v184_v24 = vperm.slane %v1296_v15, 3  ;;  %v115_v40 = vld [vmem:[#allocation7 + $0x1] ss:$8 sm:$0xf] }
  0x8a   :  { %432 = vmatpush.msra.mxu2 %v338_v28  ;;  %452 = vmatpush.msra.mxu3 %v339_v29  ;;  %v117_v16 = vperm.slane %v115_v40, 0 }
  0x8c   :  { %433 = vmatpush.msra.mxu2 %v306_v31 }
  0x8e   :  { %v255_v34 = vpop.permute.xlu0 %254  ;;  %v281_v35 = vpop.permute.xlu1 %280 }
  0x8f   :  { %v257_v37 = vsel %vm256_vm2, %v1245_v5, %v255_v34  ;;  %v260_v38 = vsel %vm256_vm2, %v255_v34, %v249_v21  ;;  %v292_v39 = vsel %vm288_vm1, %v287_v22, %v281_v35  ;;  %v219_v53 = vpop.permute.xlu2 %218  ;;  %v200_v5 = vperm.slane %v198_v44, 0 }
  0x90   :  { %v274_v41 = vmul.f32 %v266_v32, %v257_v37  ;;  %v307_v42 = vmul.f32 %v299_v33, %v292_v39  ;;  %v275_v45 = vmul.f32 %v267_v36, %v260_v38  ;;  %v183_v22 = vperm.slane %v1296_v15, 2  ;;  %v147_v32 = vld [vmem:[#allocation7 + $0x2] ss:$8 sm:$0xf] }
  0x91   :  { %v208_v25 = vmul.f32 %v200_v5, %v1175_v1  ;;  %v151_v3 = vperm.slane %v147_v32, 2  ;;  %v152_v33 = vperm.slane %v147_v32, 3  ;;  %v149_v60 = vperm.slane %v147_v32, 0 }
  0x92   :  { %434 = vmatpush.msra.mxu2 %v274_v41  ;;  %453 = vmatpush.msra.mxu3 %v307_v42  ;;  %v119_v41 = vperm.slane %v115_v40, 2  ;;  %v150_v61 = vperm.slane %v147_v32, 1 }
  0x94   :  { %454 = vmatpush.msra.mxu3 %v275_v45 }
  0x96   :  { %v221_v48 = vpop.permute.xlu0 %220  ;;  %v223_v49 = vpop.permute.xlu1 %222 }
  0x97   :  { %v225_v50 = vsel %vm224_vm3, %v221_v48, %v223_v49  ;;  %v226_v63 = vsel %vm224_vm3, %v219_v53, %v221_v48  ;;  %v172_v20 = vpop.permute.xlu2 %171  ;;  %v181_v48 = vperm.slane %v1296_v15, 0 }
  0x98   :  { %v242_v51 = vmul.f32 %v234_v46, %v225_v50  ;;  %v241_v21 = vmul.f32 %v233_v59, %v226_v63  ;;  %v83_v46 = vld [vmem:[#allocation7] ss:$8 sm:$0xf] }
  0x99   :  { %v87_v50 = vperm.slane %v83_v46, 2  ;;  %v344_v59 = vld [vmem:[%s1561_s2] sm:$0xff] }
  0x9a   :  { %435 = vmatpush.msra.mxu2 %v242_v51 }
  0x9c   :  { %436 = vmatpush.msra.mxu2 %v210_v52 }
  0x9e   :  { %v283_v0 = vpop.permute.xlu0 %282  ;;  %v217_v4 = vpop.permute.xlu1 %216 }
  0x9f   :  { %v290_v8 = vsel %vm288_vm1, %v283_v0, %v1252_v14  ;;  %v291_v9 = vsel %vm288_vm1, %v281_v35, %v283_v0  ;;  %v228_v10 = vsel %vm224_vm3, %v223_v49, %v217_v4  ;;  %v227_v17 = vsel %vm224_vm3, %v217_v4, %v219_v53  ;;  %v140_v1 = vpop.permute.xlu2 %139 }
  0xa0   :  { %v304_v11 = vmul.f32 %v296_v54, %v291_v9  ;;  %v305_v12 = vmul.f32 %v297_v55, %v290_v8  ;;  %v243_v13 = vmul.f32 %v235_v56, %v228_v10  ;;  %v272_v14 = vmul.f32 %v264_v57, %v259_v62 }
  0xa1   :  { %v240_v23 = vmul.f32 %v232_v6, %v227_v17  ;;  %v182_v49 = vperm.slane %v1296_v15, 1  ;;  %v120_v62 = vperm.slane %v115_v40, 3  ;;  %v88_v10 = vperm.slane %v83_v46, 3 }
  0xa2   :  { %393 = vmatpush.msra.mxu0 %v304_v11  ;;  %413 = vmatpush.msra.mxu1 %v305_v12  ;;  %v118_v17 = vperm.slane %v115_v40, 1 }
  0xa3   :  { %455 = vmatpush.msra.mxu3 %v243_v13 }
  0xa4   :  { %394 = vmatpush.msra.mxu0 %v272_v14  ;;  %414 = vmatpush.msra.mxu1 %v273_v19  ;;  %v85_v19 = vperm.slane %v83_v46, 0 }
  0xa5   :  { %456 = vmatpush.msra.mxu3 %v211_v18 }
  0xa6   :  { %v168_v26 = vpop.permute.xlu0 %167  ;;  %v170_v27 = vpop.permute.xlu1 %169  ;;  %395 = vmatpush.msra.mxu0 %v240_v23  ;;  %415 = vmatpush.msra.mxu1 %v241_v21 }
  0xa7   :  { %v175_v28 = vsel %vm173_vm4, %v168_v26, %v170_v27  ;;  %v174_v29 = vsel %vm173_vm4, %v170_v27, %v172_v20  ;;  %v73_v47 = vpop.permute.xlu2 %72 }
  0xa8   :  { %v191_v30 = vmul.f32 %v183_v22, %v175_v28  ;;  %v192_v31 = vmul.f32 %v184_v24, %v174_v29  ;;  %396 = vmatpush.msra.mxu0 %v208_v25  ;;  %416 = vmatpush.msra.mxu1 %v209_v2 }
  0xaa   :  { %437 = vmatpush.msra.mxu2 %v191_v30  ;;  %457 = vmatpush.msra.mxu3 %v192_v31 }
  0xae   :  { %v136_v34 = vpop.permute.xlu0 %135  ;;  %v138_v35 = vpop.permute.xlu1 %137 }
  0xaf   :  { %v143_v36 = vsel %vm141_vm5, %v136_v34, %v138_v35  ;;  %v142_v37 = vsel %vm141_vm5, %v138_v35, %v140_v1  ;;  %v75_v63 = vpop.permute.xlu2 %74  ;;  %v510_v35 = vld [vmem:[%s1564_s5] sm:$0xff] }
  0xb0   :  { %v159_v38 = vmul.f32 %v151_v3, %v143_v36  ;;  %v160_v39 = vmul.f32 %v152_v33, %v142_v37  ;;  %v79_v5 = vsel %vm78_vm7, %v73_v47, %v75_v63  ;;  %v500_v33 = vld [vmem:[%s1563_s4] sm:$0xff] }
  0xb1   :  { %v96_v15 = vmul.f32 %v88_v10, %v79_v5 }
  0xb2   :  { %438 = vmatpush.msra.mxu2 %v159_v38  ;;  %458 = vmatpush.msra.mxu3 %v160_v39 }
  0xb6   :  { %v104_v42 = vpop.permute.xlu0 %103  ;;  %v106_v43 = vpop.permute.xlu1 %105 }
  0xb7   :  { %v111_v44 = vsel %vm109_vm6, %v104_v42, %v106_v43 }
  0xb8   :  { %v127_v45 = vmul.f32 %v119_v41, %v111_v44 }
  0xba   :  { %439 = vmatpush.msra.mxu2 %v127_v45 }
  0xbe   :  { %v166_v51 = vpop.permute.xlu0 %165  ;;  %v71_v52 = vpop.permute.xlu1 %70 }
  0xbf   :  { %v176_v53 = vsel %vm173_vm4, %v166_v51, %v168_v26  ;;  %v177_v54 = vsel %vm173_vm4, %v172_v20, %v166_v51  ;;  %v80_v55 = vsel %vm78_vm7, %v71_v52, %v73_v47  ;;  %v86_v20 = vperm.slane %v83_v46, 1 }
  0xc0   :  { %v189_v56 = vmul.f32 %v181_v48, %v177_v54  ;;  %v190_v57 = vmul.f32 %v182_v49, %v176_v53  ;;  %v95_v58 = vmul.f32 %v87_v50, %v80_v55 }
  0xc2   :  { %397 = vmatpush.msra.mxu0 %v189_v56  ;;  %417 = vmatpush.msra.mxu1 %v190_v57 }
  0xc3   :  { %440 = vmatpush.msra.mxu2 %v95_v58 }
  0xc4   :  { %995 = vmatmul.msk.f32.vlgmr.msra.gmra.mxu2 %vm381_vm8, %v344_v59 }
  0xc6   :  { %v108_v0 = vpop.permute.xlu0 %107  ;;  %v134_v4 = vpop.permute.xlu1 %133 }
  0xc7   :  { %v110_v6 = vsel %vm109_vm6, %v106_v43, %v108_v0  ;;  %v144_v8 = vsel %vm141_vm5, %v134_v4, %v136_v34  ;;  %v145_v9 = vsel %vm141_vm5, %v140_v1, %v134_v4  ;;  %v1115_v34 = vmov 0  }
  0xc8   :  { %v157_v11 = vmul.f32 %v149_v60, %v145_v9  ;;  %v158_v12 = vmul.f32 %v150_v61, %v144_v8  ;;  %v128_v13 = vmul.f32 %v120_v62, %v110_v6  ;;  %1015 = vset.pattern.permute.xlu1 %v1115_v34  ;;  %1016 = vset.pattern.permute.xlu0 %v1115_v34  ;;  %v525_v6 = vstv %s1567_s8 }
  0xc9   :  { %503 = vperm.xlu1 %1015, %v500_v33  }
  0xca   :  { %398 = vmatpush.msra.mxu0 %v157_v11  ;;  %418 = vmatpush.msra.mxu1 %v158_v12 }
  0xcb   :  { %459 = vmatpush.msra.mxu3 %v128_v13 }
  0xcd   :  { %460 = vmatpush.msra.mxu3 %v96_v15 }
  0xce   :  { %v102_v18 = vpop.permute.xlu0 %101  ;;  %v69_v14 = vpop.permute.xlu1 %68  ;;  %996 = vmatmul.msk.f32.vlgmr.msra.gmra.mxu3 %vm381_vm8, %v344_v59 }
  0xcf   :  { %v112_v21 = vsel %vm109_vm6, %v102_v18, %v104_v42  ;;  %v113_v22 = vsel %vm109_vm6, %v108_v0, %v102_v18  ;;  %v81_v23 = vsel %vm78_vm7, %v69_v14, %v71_v52  ;;  %v82_v24 = vsel %vm78_vm7, %v75_v63, %v69_v14 }
  0xd0   :  { %v125_v25 = vmul.f32 %v117_v16, %v113_v22  ;;  %v126_v2 = vmul.f32 %v118_v17, %v112_v21  ;;  %v93_v26 = vmul.f32 %v85_v19, %v82_v24  ;;  %v94_v27 = vmul.f32 %v86_v20, %v81_v23  ;;  %v947_v24 = vld [vmem:[%s1565_s6] sm:$0xff] }
  0xd1   :  { %513 = vperm.xlu1 %1015, %v510_v35  }
  0xd2   :  { %399 = vmatpush.msra.mxu0 %v125_v25  ;;  %419 = vmatpush.msra.mxu1 %v126_v2  ;;  %v774_v25 = vld [vmem:[#allocation7 + $0x20] ss:$8 sm:$0xf] }
  0xd4   :  { %400 = vmatpush.msra.mxu0 %v93_v26  ;;  %420 = vmatpush.msra.mxu1 %v94_v27  ;;  %v777_v26 = vperm.slane %v774_v25, 1 }
  0xd5   :  { %993 = vmatmul.msk.f32.vlgmr.msra.gmra.mxu0 %vm381_vm8, %v344_v59  ;;  %994 = vmatmul.msk.f32.vlgmr.msra.gmra.mxu1 %vm381_vm8, %v344_v59 }
 0x13b   :  { %v504_v56 = vpop.permute.xlu1 %503 }
 0x143   :  { %v514_v4 = vpop.permute.xlu1 %513 }
 0x147   :  { %v442_v28 = vpop.f32.mrf.mxu2 }
 0x151   :  { %v462_v32 = vpop.f32.mrf.mxu3 }
 0x152   :  { %v402_v29 = vpop.f32.mrf.mxu0  ;;  %v422_v30 = vpop.f32.mrf.mxu1 }
 0x153   :  { %v465_v31 = vadd.f32 %v422_v30, %v402_v29 }
 0x155   :  { %v466_v1 = vadd.f32 %v465_v31, %v442_v28  ;;  %v957_v31 = vld [vmem:[%s1566_s7] sm:$0xff] }
 0x157   :  { %v467_v3 = vadd.f32 %v466_v1, %v462_v32  ;;  %v778_v1 = vperm.slane %v774_v25, 2 }
 0x159   :  { %468 = vadd.xlane.f32.xlu2 %v467_v3 }
 0x1cc   :  { %v469_v36 = vpop.xlane.xlu2 %468 }
 0x1cd   :  { %v470_v37 = vmul.f32 0.001953125, %v469_v36  ;;  %v744_v36 = vld [vmem:[#allocation7 + $0x7] ss:$8 sm:$0xf] }
 0x1cf   :  { %v471_v38 = vsub.f32 %v402_v29, %v470_v37  ;;  %v472_v39 = vsub.f32 %v422_v30, %v470_v37  ;;  %v473_v40 = vsub.f32 %v442_v28, %v470_v37  ;;  %v474_v41 = vsub.f32 %v462_v32, %v470_v37  ;;  %v714_v37 = vld [vmem:[#allocation7 + $0x6] ss:$8 sm:$0xf] }
 0x1d1   :  { %v475_v42 = vmul.f32 %v471_v38, %v471_v38  ;;  %v476_v43 = vmul.f32 %v472_v39, %v472_v39  ;;  %v477_v44 = vmul.f32 %v473_v40, %v473_v40  ;;  %v478_v46 = vmul.f32 %v474_v41, %v474_v41 }
 0x1d3   :  { %v479_v45 = vadd.f32 %v476_v43, %v475_v42 }
 0x1d5   :  { %v480_v47 = vadd.f32 %v479_v45, %v477_v44  ;;  %v717_v44 = vperm.slane %v714_v37, 1 }
 0x1d7   :  { %v481_v48 = vadd.f32 %v480_v47, %v478_v46 }
 0x1d9   :  { %482 = vadd.xlane.f32.xlu0 %v481_v48  ;;  %v1458_v48 = vld [vmem:[#allocation7 + $0x4] ss:$8 sm:$0xf] }
 0x24c   :  { %v483_v49 = vpop.xlane.xlu0 %482 }
 0x24d   :  { %v484_v50 = vmul.f32 0.001953125, %v483_v49 }
 0x24f   :  { %v485_v51 = vadd.f32 1e-05, %v484_v50 }
 0x251   :  { %1017 = vrsqrt.f32 %v485_v51  ;;  %vm492_vm10 = vweird.f32 %v485_v51 }
 0x257   :  { %v1018_v52 = vpop.eup %1017 }
 0x258   :  { %v487_v53 = vmul.f32 %v1018_v52, %v485_v51  ;;  %vm493_vm9 = vweird.f32 %v1018_v52 }
 0x259   :  { %vm494_vm11 = vmor %vm492_vm10, %vm493_vm9 }
 0x25a   :  { %v488_v54 = vmul.f32 %v1018_v52, %v487_v53 }
 0x25c   :  { %v489_v55 = vmul.f32 0.5, %v488_v54  ;;  %v657_v54 = vperm.slane %v1458_v48, 1 }
 0x25e   :  { %v490_v57 = vsub.f32 1.5, %v489_v55 }
 0x260   :  { %v491_v58 = vmul.f32 %v1018_v52, %v490_v57  ;;  %v779_v57 = vperm.slane %v774_v25, 3 }
 0x262   :  { %v495_v59 = vsel %vm494_vm11, %v1018_v52, %v491_v58 }
 0x263   :  { %v498_v60 = vmul.f32 %v495_v59, %v473_v40  ;;  %v499_v61 = vmul.f32 %v495_v59, %v474_v41  ;;  %v497_v62 = vmul.f32 %v495_v59, %v472_v39  ;;  %v496_v12 = vmul.f32 %v495_v59, %v471_v38  ;;  %v1447_v41 = vld [vmem:[#allocation7 + $0x5] ss:$8 sm:$0xf] }
 0x264   :  { %v747_v38 = vperm.slane %v744_v36, 1  ;;  %v748_v39 = vperm.slane %v744_v36, 2  ;;  %v687_v51 = vperm.slane %v1447_v41, 1 }
 0x265   :  { %v508_v63 = vmul.f32 %v504_v56, %v498_v60  ;;  %v509_v0 = vmul.f32 %v504_v56, %v499_v61  ;;  %v507_v10 = vmul.f32 %v504_v56, %v497_v62  ;;  %v506_v17 = vmul.f32 %v504_v56, %v496_v12 }
 0x266   :  { %v776_v56 = vperm.slane %v774_v25, 0 }
 0x267   :  { %v518_v8 = vadd.f32 %v514_v4, %v508_v63  ;;  %v519_v9 = vadd.f32 %v514_v4, %v509_v0  ;;  %v517_v13 = vadd.f32 %v514_v4, %v507_v10  ;;  %v516_v14 = vadd.f32 %v514_v4, %v506_v17 }
 0x268   :  { %v718_v4 = vperm.slane %v714_v37, 2  ;;  %v716_v17 = vperm.slane %v714_v37, 0 }
 0x269   :  { %vm523_vm12 = vcmp.ge.f32.partialorder %v518_v8, 0.0  ;;  %vm524_vm13 = vcmp.ge.f32.partialorder %v519_v9, 0.0  ;;  %v528_v5 = vmul.f32 %v525_v6, %v518_v8  ;;  %v529_v11 = vmul.f32 %v525_v6, %v519_v9 }
 0x26a   :  { %v527_v18 = vmul.f32 %v525_v6, %v517_v13  ;;  %vm522_vm14 = vcmp.ge.f32.partialorder %v517_v13, 0.0  ;;  %v526_v20 = vmul.f32 %v525_v6, %v516_v14  ;;  %vm521_vm15 = vcmp.ge.f32.partialorder %v516_v14, 0.0 }
 0x26b   :  { %v1359_v15 = vsel %vm523_vm12, %v518_v8, %v528_v5  ;;  %v1361_v16 = vsel %vm524_vm13, %v519_v9, %v529_v11  ;;  %v746_v5 = vperm.slane %v744_v36, 0  ;;  %v749_v11 = vperm.slane %v744_v36, 3 }
 0x26c   :  { %738 = vrot.lane.b32.xlu2 %v1361_v16, %s1107_s0  ;;  %706 = vrot.lane.b32.xlu0 %v1359_v15, %s1109_s21  ;;  %v1369_v19 = vsel %vm522_vm14, %v517_v13, %v527_v18  ;;  %v1377_v21 = vsel %vm521_vm15, %v516_v14, %v526_v20  ;;  %v719_v18 = vperm.slane %v714_v37, 3  ;;  %v686_v37 = vperm.slane %v1447_v41, 0 }
 0x26d   :  { %766 = vrot.lane.b32.xlu1 %v1359_v15, %s1108_s1  ;;  %v665_v60 = vmul.f32 %v657_v54, %v1369_v19 }
 0x274   :  { %676 = vrot.lane.b32.xlu0 %v1359_v15, %s1110_s22  ;;  %764 = vrot.lane.b32.xlu2 %v1369_v19, %s1108_s1 }
 0x275   :  { %768 = vrot.lane.b32.xlu1 %v1361_v16, %s1108_s1 }
 0x27c   :  { %734 = vrot.lane.b32.xlu0 %v1369_v19, %s1107_s0  ;;  %702 = vrot.lane.b32.xlu2 %v1377_v21, %s1109_s21 }
 0x27d   :  { %736 = vrot.lane.b32.xlu1 %v1359_v15, %s1107_s0 }
 0x284   :  { %626 = vrot.lane.b32.xlu0 %v1369_v19, %s1111_s23  ;;  %704 = vrot.lane.b32.xlu2 %v1369_v19, %s1109_s21 }
 0x285   :  { %762 = vrot.lane.b32.xlu1 %v1377_v21, %s1108_s1 }
 0x28c   :  { %596 = vrot.lane.b32.xlu0 %v1369_v19, %s1112_s24  ;;  %674 = vrot.lane.b32.xlu2 %v1369_v19, %s1110_s22 }
 0x28d   :  { %708 = vrot.lane.b32.xlu1 %v1361_v16, %s1109_s21 }
 0x294   :  { %566 = vrot.lane.b32.xlu0 %v1369_v19, %s1113_s25  ;;  %630 = vrot.lane.b32.xlu2 %v1361_v16, %s1111_s23 }
 0x295   :  { %732 = vrot.lane.b32.xlu1 %v1377_v21, %s1107_s0 }
 0x29c   :  { %624 = vrot.lane.b32.xlu0 %v1377_v21, %s1111_s23  ;;  %600 = vrot.lane.b32.xlu2 %v1361_v16, %s1112_s24 }
 0x29d   :  { %678 = vrot.lane.b32.xlu1 %v1361_v16, %s1110_s22 }
 0x2a4   :  { %570 = vrot.lane.b32.xlu0 %v1361_v16, %s1113_s25  ;;  %538 = vrot.lane.b32.xlu2 %v1359_v15, %s1114_s26 }
 0x2a5   :  { %672 = vrot.lane.b32.xlu1 %v1377_v21, %s1110_s22 }
 0x2ac   :  { %564 = vrot.lane.b32.xlu0 %v1377_v21, %s1113_s25  ;;  %540 = vrot.lane.b32.xlu2 %v1361_v16, %s1114_s26 }
 0x2ad   :  { %628 = vrot.lane.b32.xlu1 %v1359_v15, %s1111_s23 }
 0x2b5   :  { %598 = vrot.lane.b32.xlu1 %v1359_v15, %s1112_s24 }
 0x2bd   :  { %568 = vrot.lane.b32.xlu1 %v1359_v15, %s1113_s25 }
 0x2c5   :  { %536 = vrot.lane.b32.xlu1 %v1369_v19, %s1114_s26 }
 0x2c6   :  { %v1427_v22 = vpop.permute.xlu2 %738 }
 0x2cd   :  { %594 = vrot.lane.b32.xlu1 %v1377_v21, %s1112_s24 }
 0x2ce   :  { %v765_v23 = vpop.permute.xlu2 %764 }
 0x2d5   :  { %534 = vrot.lane.b32.xlu1 %v1377_v21, %s1114_s26 }
 0x2d6   :  { %v1436_v2 = vpop.permute.xlu2 %702 }
 0x2dd   :  { %950 = vperm.xlu1 %1015, %v947_v24  }
 0x2de   :  { %v707_v27 = vpop.permute.xlu0 %706  ;;  %v705_v32 = vpop.permute.xlu2 %704 }
 0x2df   :  { %v767_v28 = vpop.permute.xlu1 %766  ;;  %v711_v45 = vsel %vm256_vm2, %v705_v32, %v707_v27  ;;  %v712_v14 = vsel %vm256_vm2, %v1436_v2, %v705_v32 }
 0x2e0   :  { %v771_v29 = vsel %vm320_vm0, %v765_v23, %v767_v28  ;;  %v725_v53 = vmul.f32 %v717_v44, %v711_v45 }
 0x2e1   :  { %v785_v30 = vmul.f32 %v777_v26, %v771_v29  ;;  %v636_v26 = vld [vmem:[#allocation7 + $0x3] ss:$8 sm:$0xf] }
 0x2e2   :  { %v639_v29 = vperm.slane %v636_v26, 1 }
 0x2e3   :  { %859 = vmatpush.msrb.mxu1 %v785_v30  ;;  %v688_v30 = vperm.slane %v1447_v41, 2 }
 0x2e5   :  { %960 = vperm.xlu1 %1015, %v957_v31  }
 0x2e6   :  { %v1443_v3 = vpop.permute.xlu0 %676  ;;  %v1449_v42 = vpop.permute.xlu2 %674 }
 0x2e7   :  { %v769_v33 = vpop.permute.xlu1 %768  ;;  %v681_v52 = vsel %vm224_vm3, %v1449_v42, %v1443_v3 }
 0x2e8   :  { %v770_v34 = vsel %vm320_vm0, %v767_v28, %v769_v33  ;;  %v695_v55 = vmul.f32 %v687_v51, %v681_v52  ;;  %v641_v51 = vperm.slane %v636_v26, 3 }
 0x2e9   :  { %v786_v35 = vmul.f32 %v778_v1, %v770_v34 }
 0x2eb   :  { %879 = vmatpush.msrb.mxu2 %v786_v35 }
 0x2ee   :  { %v735_v40 = vpop.permute.xlu0 %734  ;;  %v631_v31 = vpop.permute.xlu2 %630 }
 0x2ef   :  { %v737_v43 = vpop.permute.xlu1 %736 }
 0x2f0   :  { %v740_v46 = vsel %vm288_vm1, %v737_v43, %v1427_v22  ;;  %v741_v47 = vsel %vm288_vm1, %v735_v40, %v737_v43  ;;  %v659_v43 = vperm.slane %v1458_v48, 3 }
 0x2f1   :  { %v755_v49 = vmul.f32 %v747_v38, %v741_v47  ;;  %v756_v50 = vmul.f32 %v748_v39, %v740_v46  ;;  %v689_v38 = vperm.slane %v1447_v41, 3  ;;  %v638_v47 = vperm.slane %v636_v26, 0 }
 0x2f3   :  { %860 = vmatpush.msrb.mxu1 %v755_v49  ;;  %880 = vmatpush.msrb.mxu2 %v756_v50  ;;  %v640_v50 = vperm.slane %v636_v26, 2 }
 0x2f5   :  { %861 = vmatpush.msrb.mxu1 %v725_v53 }
 0x2f6   :  { %v1466_v58 = vpop.permute.xlu0 %626  ;;  %v1508_v45 = vpop.permute.xlu2 %600 }
 0x2f7   :  { %862 = vmatpush.msrb.mxu1 %v695_v55  ;;  %v763_v59 = vpop.permute.xlu1 %762 }
 0x2f8   :  { %v772_v61 = vsel %vm320_vm0, %v763_v59, %v765_v23  ;;  %v773_v62 = vsel %vm320_vm0, %v769_v33, %v763_v59 }
 0x2f9   :  { %863 = vmatpush.msrb.mxu1 %v665_v60  ;;  %v784_v63 = vmul.f32 %v776_v56, %v772_v61  ;;  %v787_v0 = vmul.f32 %v779_v57, %v773_v62  ;;  %v606_v57 = vld [vmem:[#allocation7 + $0x2] ss:$8 sm:$0xf] }
 0x2fa   :  { %v611_v59 = vperm.slane %v606_v57, 3 }
 0x2fb   :  { %839 = vmatpush.msrb.mxu0 %v784_v63  ;;  %899 = vmatpush.msrb.mxu3 %v787_v0 }
 0x2fe   :  { %v1473_v6 = vpop.permute.xlu0 %596 }
 0x2ff   :  { %v709_v8 = vpop.permute.xlu1 %708 }
 0x300   :  { %v710_v9 = vsel %vm256_vm2, %v707_v27, %v709_v8  ;;  %v713_v19 = vsel %vm256_vm2, %v709_v8, %v1436_v2  ;;  %v724_v27 = vmul.f32 %v716_v17, %v712_v14 }
 0x301   :  { %v726_v10 = vmul.f32 %v718_v4, %v710_v9  ;;  %v727_v28 = vmul.f32 %v719_v18, %v713_v19  ;;  %v546_v4 = vld [vmem:[#allocation7] ss:$8 sm:$0xf] }
 0x303   :  { %881 = vmatpush.msrb.mxu2 %v726_v10 }
 0x306   :  { %v1477_v12 = vpop.permute.xlu0 %566 }
 0x307   :  { %v733_v13 = vpop.permute.xlu1 %732 }
 0x308   :  { %v742_v20 = vsel %vm288_vm1, %v733_v13, %v735_v40  ;;  %v743_v23 = vsel %vm288_vm1, %v1427_v22, %v733_v13  ;;  %v658_v22 = vperm.slane %v1458_v48, 2  ;;  %v656_v40 = vperm.slane %v1458_v48, 0 }
 0x309   :  { %v754_v24 = vmul.f32 %v746_v5, %v742_v20  ;;  %v757_v25 = vmul.f32 %v749_v11, %v743_v23  ;;  %v667_v48 = vmul.f32 %v659_v43, %v1361_v16  ;;  %v610_v16 = vperm.slane %v606_v57, 2 }
 0x30a   :  { %v666_v36 = vmul.f32 %v658_v22, %v1359_v15  ;;  %v664_v49 = vmul.f32 %v656_v40, %v1377_v21  ;;  %v539_v21 = vpop.permute.xlu2 %538  ;;  %v551_v13 = vperm.slane %v546_v4, 3  ;;  %v549_v40 = vperm.slane %v546_v4, 1 }
 0x30b   :  { %840 = vmatpush.msrb.mxu0 %v754_v24  ;;  %900 = vmatpush.msrb.mxu3 %v757_v25  ;;  %v550_v24 = vperm.slane %v546_v4, 2  ;;  %v792_v25 = vld [vmem:[%s1562_s3] sm:$0xff]  ;;  %s1116_s3 = smov [#allocation9]  }
 0x30c   :  { %s980_s14 = sshll.u32 %s1116_s3, 4  ;;  %s981_s14 = int_to_ptr.vmem [resolvable:$true] %s980_s14 }
 0x30d   :  { %841 = vmatpush.msrb.mxu0 %v724_v27  ;;  %901 = vmatpush.msrb.mxu3 %v727_v28 }
 0x30e   :  { %v625_v2 = vpop.permute.xlu0 %624 }
 0x30f   :  { %v634_v32 = vsel %vm173_vm4, %v625_v2, %v1466_v58  ;;  %v679_v1 = vpop.permute.xlu1 %678  ;;  %v635_v41 = vsel %vm173_vm4, %v631_v31, %v625_v2  ;;  %v609_v2 = vperm.slane %v606_v57, 1 }
 0x310   :  { %v680_v33 = vsel %vm224_vm3, %v1443_v3, %v679_v1  ;;  %v647_v34 = vmul.f32 %v639_v29, %v634_v32 }
 0x311   :  { %v696_v35 = vmul.f32 %v688_v30, %v680_v33  ;;  %v608_v30 = vperm.slane %v606_v57, 0 }
 0x312   :  { %864 = vmatpush.msrb.mxu1 %v647_v34  ;;  %v541_v8 = vpop.permute.xlu2 %540 }
 0x313   :  { %882 = vmatpush.msrb.mxu2 %v696_v35  ;;  %v542_v17 = vsel %vm78_vm7, %v539_v21, %v541_v8 }
 0x314   :  { %v559_v23 = vmul.f32 %v551_v13, %v542_v17 }
 0x315   :  { %883 = vmatpush.msrb.mxu2 %v666_v36 }
 0x316   :  { %v571_v5 = vpop.permute.xlu0 %570 }
 0x317   :  { %v673_v39 = vpop.permute.xlu1 %672 }
 0x318   :  { %v682_v3 = vsel %vm224_vm3, %v673_v39, %v1449_v42  ;;  %v683_v44 = vsel %vm224_vm3, %v679_v1, %v673_v39  ;;  %v646_v42 = vmul.f32 %v638_v47, %v635_v41 }
 0x319   :  { %v694_v15 = vmul.f32 %v686_v37, %v682_v3  ;;  %v697_v46 = vmul.f32 %v689_v38, %v683_v44 }
 0x31b   :  { %842 = vmatpush.msrb.mxu0 %v694_v15  ;;  %902 = vmatpush.msrb.mxu3 %v697_v46 }
 0x31d   :  { %843 = vmatpush.msrb.mxu0 %v664_v49  ;;  %903 = vmatpush.msrb.mxu3 %v667_v48 }
 0x31e   :  { %v565_v29 = vpop.permute.xlu0 %564 }
 0x31f   :  { %v629_v52 = vpop.permute.xlu1 %628  ;;  %844 = vmatpush.msrb.mxu0 %v646_v42  ;;  %v574_v22 = vsel %vm109_vm6, %v565_v29, %v1477_v12  ;;  %v575_v33 = vsel %vm109_vm6, %v571_v5, %v565_v29 }
 0x320   :  { %v632_v53 = vsel %vm173_vm4, %v629_v52, %v631_v31  ;;  %v633_v54 = vsel %vm173_vm4, %v1466_v58, %v629_v52  ;;  %v576_v58 = vld [vmem:[#allocation7 + $0x1] ss:$8 sm:$0xf] }
 0x321   :  { %v648_v55 = vmul.f32 %v640_v50, %v633_v54  ;;  %v649_v56 = vmul.f32 %v641_v51, %v632_v53  ;;  %v580_v9 = vperm.slane %v576_v58, 2  ;;  %v581_v10 = vperm.slane %v576_v58, 3 }
 0x322   :  { %v578_v32 = vperm.slane %v576_v58, 0  ;;  %v579_v1 = vperm.slane %v576_v58, 1 }
 0x323   :  { %884 = vmatpush.msrb.mxu2 %v648_v55  ;;  %904 = vmatpush.msrb.mxu3 %v649_v56 }
 0x324   :  { %v586_v38 = vmul.f32 %v578_v32, %v575_v33  ;;  %v587_v39 = vmul.f32 %v579_v1, %v574_v22  ;;  %v1023_v1 = vld [vmem:[#allocation4 + $0x10] sm:$0xff]  ;;  %v1024_v33 = vld [vmem:[#allocation4 + $0x18] sm:$0xff] }
 0x327   :  { %v599_v60 = vpop.permute.xlu1 %598 }
 0x328   :  { %v602_v61 = vsel %vm141_vm5, %v599_v60, %v1508_v45  ;;  %v603_v62 = vsel %vm141_vm5, %v1473_v6, %v599_v60 }
 0x329   :  { %v618_v63 = vmul.f32 %v610_v16, %v603_v62  ;;  %v619_v0 = vmul.f32 %v611_v59, %v602_v61 }
 0x32b   :  { %885 = vmatpush.msrb.mxu2 %v618_v63  ;;  %905 = vmatpush.msrb.mxu3 %v619_v0 }
 0x32f   :  { %v569_v11 = vpop.permute.xlu1 %568 }
 0x330   :  { %v572_v18 = vsel %vm109_vm6, %v569_v11, %v571_v5  ;;  %v573_v14 = vsel %vm109_vm6, %v1477_v12, %v569_v11  ;;  %v548_v12 = vperm.slane %v546_v4, 0 }
 0x331   :  { %v588_v19 = vmul.f32 %v580_v9, %v573_v14  ;;  %v589_v20 = vmul.f32 %v581_v10, %v572_v18 }
 0x333   :  { %886 = vmatpush.msrb.mxu2 %v588_v19  ;;  %906 = vmatpush.msrb.mxu3 %v589_v20 }
 0x335   :  { %907 = vmatpush.msrb.mxu3 %v559_v23 }
 0x336   :  { %1000 = vmatmul.msk.f32.vlgmr.msrb.gmra.mxu3 %vm381_vm8, %v792_v25 }
 0x337   :  { %v537_v26 = vpop.permute.xlu1 %536 }
 0x338   :  { %v543_v27 = vsel %vm78_vm7, %v537_v26, %v539_v21 }
 0x339   :  { %v558_v28 = vmul.f32 %v550_v24, %v543_v27 }
 0x33b   :  { %887 = vmatpush.msrb.mxu2 %v558_v28 }
 0x33c   :  { %999 = vmatmul.msk.f32.vlgmr.msrb.gmra.mxu2 %vm381_vm8, %v792_v25 }
 0x33f   :  { %v595_v31 = vpop.permute.xlu1 %594 }
 0x340   :  { %v604_v34 = vsel %vm141_vm5, %v595_v31, %v1473_v6  ;;  %v605_v35 = vsel %vm141_vm5, %v1508_v45, %v595_v31  ;;  %v1022_v31 = vld [vmem:[#allocation4 + $0x8] sm:$0xff] }
 0x341   :  { %v616_v36 = vmul.f32 %v608_v30, %v605_v35  ;;  %v617_v37 = vmul.f32 %v609_v2, %v604_v34  ;;  %v1021_v30 = vld [vmem:[#allocation4] sm:$0xff] }
 0x343   :  { %845 = vmatpush.msrb.mxu0 %v616_v36  ;;  %865 = vmatpush.msrb.mxu1 %v617_v37 }
 0x345   :  { %846 = vmatpush.msrb.mxu0 %v586_v38  ;;  %866 = vmatpush.msrb.mxu1 %v587_v39 }
 0x347   :  { %v535_v43 = vpop.permute.xlu1 %534 }
 0x348   :  { %v544_v3 = vsel %vm78_vm7, %v535_v43, %v537_v26  ;;  %v545_v6 = vsel %vm78_vm7, %v541_v8, %v535_v43 }
 0x349   :  { %v556_v44 = vmul.f32 %v548_v12, %v545_v6  ;;  %v557_v15 = vmul.f32 %v549_v40, %v544_v3 }
 0x34b   :  { %847 = vmatpush.msrb.mxu0 %v556_v44  ;;  %867 = vmatpush.msrb.mxu1 %v557_v15 }
 0x34c   :  { %997 = vmatmul.msk.f32.vlgmr.msrb.gmra.mxu0 %vm381_vm8, %v792_v25  ;;  %998 = vmatmul.msk.f32.vlgmr.msrb.gmra.mxu1 %vm381_vm8, %v792_v25 }
 0x34f   :  { %v951_v8 = vpop.permute.xlu1 %950 }
 0x357   :  { %v961_v25 = vpop.permute.xlu1 %960 }
 0x3b9   :  { %v909_v49 = vpop.f32.mrf.mxu3 }
 0x3bf   :  { %v889_v45 = vpop.f32.mrf.mxu2 }
 0x3c9   :  { %v849_v46 = vpop.f32.mrf.mxu0  ;;  %v869_v47 = vpop.f32.mrf.mxu1 }
 0x3ca   :  { %v912_v41 = vadd.f32 %v869_v47, %v849_v46 }
 0x3cc   :  { %v913_v48 = vadd.f32 %v912_v41, %v889_v45 }
 0x3ce   :  { %v914_v42 = vadd.f32 %v913_v48, %v909_v49 }
 0x3d0   :  { %915 = vadd.xlane.f32.xlu2 %v914_v42 }
 0x443   :  { %v916_v50 = vpop.xlane.xlu2 %915 }
 0x444   :  { %v917_v51 = vmul.f32 0.001953125, %v916_v50 }
 0x446   :  { %v918_v7 = vsub.f32 %v849_v46, %v917_v51  ;;  %v919_v52 = vsub.f32 %v869_v47, %v917_v51  ;;  %v920_v53 = vsub.f32 %v889_v45, %v917_v51  ;;  %v921_v54 = vsub.f32 %v909_v49, %v917_v51 }
 0x448   :  { %v922_v55 = vmul.f32 %v918_v7, %v918_v7  ;;  %v923_v56 = vmul.f32 %v919_v52, %v919_v52  ;;  %v924_v57 = vmul.f32 %v920_v53, %v920_v53  ;;  %v925_v16 = vmul.f32 %v921_v54, %v921_v54 }
 0x44a   :  { %v926_v21 = vadd.f32 %v923_v56, %v922_v55 }
 0x44c   :  { %v927_v59 = vadd.f32 %v926_v21, %v924_v57 }
 0x44e   :  { %v928_v60 = vadd.f32 %v927_v59, %v925_v16 }
 0x450   :  { %929 = vadd.xlane.f32.xlu0 %v928_v60 }
 0x4c3   :  { %v930_v61 = vpop.xlane.xlu0 %929 }
 0x4c4   :  { %v931_v62 = vmul.f32 0.001953125, %v930_v61 }
 0x4c6   :  { %v932_v63 = vadd.f32 1e-05, %v931_v62 }
 0x4c8   :  { %1019 = vrsqrt.f32 %v932_v63  ;;  %vm939_vm1 = vweird.f32 %v932_v63 }
 0x4ce   :  { %v1020_v0 = vpop.eup %1019 }
 0x4cf   :  { %v934_v58 = vmul.f32 %v1020_v0, %v932_v63  ;;  %vm940_vm0 = vweird.f32 %v1020_v0 }
 0x4d0   :  { %vm941_vm2 = vmor %vm939_vm1, %vm940_vm0 }
 0x4d1   :  { %v935_v4 = vmul.f32 %v1020_v0, %v934_v58 }
 0x4d3   :  { %v936_v9 = vmul.f32 0.5, %v935_v4 }
 0x4d5   :  { %v937_v10 = vsub.f32 1.5, %v936_v9 }
 0x4d7   :  { %v938_v5 = vmul.f32 %v1020_v0, %v937_v10 }
 0x4d9   :  { %v942_v11 = vsel %vm941_vm2, %v1020_v0, %v938_v5 }
 0x4da   :  { %v943_v13 = vmul.f32 %v942_v11, %v918_v7  ;;  %v944_v17 = vmul.f32 %v942_v11, %v919_v52  ;;  %v945_v18 = vmul.f32 %v942_v11, %v920_v53  ;;  %v946_v14 = vmul.f32 %v942_v11, %v921_v54 }
 0x4dc   :  { %v953_v19 = vmul.f32 %v951_v8, %v943_v13  ;;  %v954_v20 = vmul.f32 %v951_v8, %v944_v17  ;;  %v955_v23 = vmul.f32 %v951_v8, %v945_v18  ;;  %v956_v24 = vmul.f32 %v951_v8, %v946_v14 }
 0x4de   :  { %v963_v26 = vadd.f32 %v961_v25, %v953_v19  ;;  %v964_v27 = vadd.f32 %v961_v25, %v954_v20  ;;  %v965_v28 = vadd.f32 %v961_v25, %v955_v23  ;;  %v966_v29 = vadd.f32 %v961_v25, %v956_v24 }
 0x4e0   :  { %v967_v2 = vadd.f32 %v1021_v30, %v963_v26  ;;  %v968_v32 = vadd.f32 %v1022_v31, %v964_v27  ;;  %v969_v22 = vadd.f32 %v1023_v1, %v965_v28  ;;  %v970_v34 = vadd.f32 %v1024_v33, %v966_v29 }
 0x4e2   :  { %971 = vst [vmem:[#allocation9] sm:$0xff] %v967_v2 }
 0x4e3   :  { %972 = vst [vmem:[#allocation9 + $0x8] sm:$0xff] %v968_v32 }
 0x4e4   :  { %973 = vst [vmem:[#allocation9 + $0x10] sm:$0xff] %v969_v22 }
 0x4e5   :  { %974 = vst [vmem:[#allocation9 + $0x18] sm:$0xff] %v970_v34 }
 0x4e6   :  { %985 = dma.vmem_to_hbm [thread:$0]  %s981_s14, 512, %s983_s17, [#allocation6]  }
 0x4e7   :  { %1101 = dma.done.wait [#allocation6], 512  }
 0x4e8   :  { %1102 = vsyncadd [#allocation6], 4294966784 }
 0x4e9   :  { %990 = vsyncpa [#allocation5], 1 }
 0x4ea   :  { %991 = vsyncpa [#allocation8], 1 }
 0x4eb   :  { %992 = vsyncpa [#allocation6], 1 }

</bundles_post_ra>
